<compile_context>
chip_gen: v5e
topology: v5e:2x2
jax: 0.10.0
libtpu: 0.0.40
codegen_flags: <defaults>
</compile_context>

<pallas_src>
import functools

import jax
import jax.numpy as jnp
from jax.experimental import pallas as pl
from jax.experimental.pallas import tpu as pltpu

EPS = 1e-5
MAX_TILE = 1024                 # max pixels per tile (lane axis)
MAX_FULL = 2048                 # below this, just take the whole row per image
VMEM_LIMIT = 32 * 1024 * 1024   # explicit budget, safe on v5e/v6e/v7x


# ----------------------------------------------------------------------------
# In-kernel helpers
# ----------------------------------------------------------------------------
def _bn(h, st_ref, g_ref, b_ref, inv_count):
    """Training-mode BatchNorm from accumulated [sum, sumsq] stats (one pass).

    h: (C, TM); st_ref: (C, 2); g_ref/b_ref: (C, 1); inv_count: python float.
    """
    mean = st_ref[:, 0:1] * inv_count
    var = st_ref[:, 1:2] * inv_count - mean * mean
    scale = jax.lax.rsqrt(var + EPS) * g_ref[...]        # rsqrt -> EUP slot
    return (h - mean) * scale + b_ref[...]


def _init_stats(st_ref):
    @pl.when(jnp.logical_and(pl.program_id(0) == 0, pl.program_id(1) == 0))
    def _():
        st_ref[...] = jnp.zeros_like(st_ref)


def _accum_stats(st_ref, v, hw, tm):
    """Accumulate per-channel [sum, sumsq] of v (C, TM) into st_ref (C, 2).

    Masks out-of-range pixel columns when tm does not divide hw (partial last
    block), so batch statistics stay exact.
    """
    if hw % tm:
        col = pl.program_id(1) * tm + jax.lax.broadcasted_iota(jnp.int32, v.shape, 1)
        v = jnp.where(col < hw, v, 0.0)
    st_ref[:, 0:1] += jnp.sum(v, axis=1, keepdims=True)
    st_ref[:, 1:2] += jnp.sum(v * v, axis=1, keepdims=True)


# ----------------------------------------------------------------------------
# Kernels (all operate on (1, C, TM) activation blocks, pixels on the lane axis)
# ----------------------------------------------------------------------------
def stats1_kernel(x_ref, w1_ref, h1_ref, st_ref, *, tm, hw):
    """conv1 (1x1) -> accumulate bn1 sum/sumsq; also writes h1 (pre-BN)."""
    _init_stats(st_ref)
    h1 = jnp.dot(w1_ref[...], x_ref[0], preferred_element_type=jnp.float32)
    h1_ref[0] = h1
    _accum_stats(st_ref, h1, hw, tm)


def apply1_kernel(h1_ref, st1_ref, g1_ref, b1_ref, y1_ref, *, inv_m):
    """bn1 -> relu, tiled over pixels ("parallel" grid)."""
    y1_ref[0] = jnp.maximum(_bn(h1_ref[0], st1_ref, g1_ref, b1_ref, inv_m), 0.0)


def stats2_kernel(y_ref, w2_ref, st_ref, *, tm, hw):
    """conv2 (1x1, padded/strided input) -> accumulate bn2 sum/sumsq."""
    _init_stats(st_ref)
    h2 = jnp.dot(w2_ref[...], y_ref[0], preferred_element_type=jnp.float32)
    _accum_stats(st_ref, h2, hw, tm)


def stats3_kernel(y_ref, w2_ref, st2_ref, g2_ref, b2_ref, w3_ref, st_ref,
                  *, tm, hw, inv_m):
    """Recompute up to conv3 output -> accumulate bn3 sum/sumsq."""
    _init_stats(st_ref)
    h2 = jnp.dot(w2_ref[...], y_ref[0], preferred_element_type=jnp.float32)
    a2 = jnp.maximum(_bn(h2, st2_ref, g2_ref, b2_ref, inv_m), 0.0)
    h3 = jnp.dot(w3_ref[...], a2, preferred_element_type=jnp.float32)
    _accum_stats(st_ref, h3, hw, tm)


def statsd_kernel(y_ref, w2_ref, st2_ref, g2_ref, b2_ref,
                  w3_ref, st3_ref, g3_ref, b3_ref, wd_ref, st_ref,
                  *, tm, hw, inv_m):
    """Recompute up to the downsample conv output -> accumulate bnd sum/sumsq."""
    _init_stats(st_ref)
    h2 = jnp.dot(w2_ref[...], y_ref[0], preferred_element_type=jnp.float32)
    a2 = jnp.maximum(_bn(h2, st2_ref, g2_ref, b2_ref, inv_m), 0.0)
    h3 = jnp.dot(w3_ref[...], a2, preferred_element_type=jnp.float32)
    x3 = _bn(h3, st3_ref, g3_ref, b3_ref, inv_m)
    hd = jnp.dot(wd_ref[...], x3, preferred_element_type=jnp.float32)
    _accum_stats(st_ref, hd, hw, tm)


def final_kernel(y_ref, w2_ref, st2_ref, g2_ref, b2_ref,
                 w3_ref, st3_ref, g3_ref, b3_ref,
                 wd_ref, std_ref, gd_ref, bd_ref, o_ref, *, inv_m):
    """conv2->bn2->relu->conv3->bn3, residual = bnd(convd(x3)), add, relu."""
    h2 = jnp.dot(w2_ref[...], y_ref[0], preferred_element_type=jnp.float32)
    a2 = jnp.maximum(_bn(h2, st2_ref, g2_ref, b2_ref, inv_m), 0.0)
    h3 = jnp.dot(w3_ref[...], a2, preferred_element_type=jnp.float32)
    x3 = _bn(h3, st3_ref, g3_ref, b3_ref, inv_m)
    hd = jnp.dot(wd_ref[...], x3, preferred_element_type=jnp.float32)
    res = _bn(hd, std_ref, gd_ref, bd_ref, inv_m)
    o_ref[0] = jnp.maximum(x3 + res, 0.0)


# ----------------------------------------------------------------------------
# Wrapper
# ----------------------------------------------------------------------------
def _pick_tile(hw):
    """Largest multiple of 128 <= MAX_TILE dividing hw; else the whole row if
    small; else MAX_TILE with a masked partial last block."""
    start = min(MAX_TILE, hw) // 128 * 128
    for t in range(start, 0, -128):
        if hw % t == 0:
            return t
    if hw <= MAX_FULL:
        return hw
    return MAX_TILE


def _act_spec(c, tm):
    return pl.BlockSpec((1, c, tm), lambda n, t: (n, 0, t))


def _const_spec(shape):
    return pl.BlockSpec(shape, lambda n, t: (0,) * len(shape))


def _cparams(parallel):
    sem = ("parallel", "parallel") if parallel else ("arbitrary", "arbitrary")
    return pltpu.CompilerParams(dimension_semantics=sem,
                                vmem_limit_bytes=VMEM_LIMIT)


def bottleneck_forward(x, p, stride=1):
    """x: (N, Cin, H, W) float32 NCHW. Weights stored PyTorch-style (Cout, Cin).
    Returns NCHW output."""
    N, Cin, H, W = x.shape
    Cout = p["w1"].shape[0]
    Cexp = p["w3"].shape[0]
    f32 = jnp.float32

    # ---- Stage 1: conv1 (1x1) -> bn1 -> relu --------------------------------
    hw1 = H * W
    tm1 = _pick_tile(hw1)
    grid1 = (N, pl.cdiv(hw1, tm1))
    inv_m1 = 1.0 / float(N * hw1)
    x3d = x.reshape(N, Cin, hw1)          # NCHW is channels-leading: free reshape

    h1, st1 = pl.pallas_call(
        functools.partial(stats1_kernel, tm=tm1, hw=hw1),
        out_shape=(jax.ShapeDtypeStruct((N, Cout, hw1), f32),
                   jax.ShapeDtypeStruct((Cout, 2), f32)),
        grid=grid1,
        in_specs=[_act_spec(Cin, tm1), _const_spec((Cout, Cin))],
        out_specs=(_act_spec(Cout, tm1), _const_spec((Cout, 2))),
        compiler_params=_cparams(parallel=False),
    )(x3d, p["w1"])

    y1 = pl.pallas_call(
        functools.partial(apply1_kernel, inv_m=inv_m1),
        out_shape=jax.ShapeDtypeStruct((N, Cout, hw1), f32),
        grid=grid1,
        in_specs=[_act_spec(Cout, tm1), _const_spec((Cout, 2)),
                  _const_spec((Cout, 1)), _const_spec((Cout, 1))],
        out_specs=_act_spec(Cout, tm1),
        compiler_params=_cparams(parallel=True),
    )(h1, st1, p["g1"], p["b1"])

    # ---- conv2's padding=1 / stride: pure layout glue on the smallest tensor.
    # TODO(synk): fold the zero border + stride subsample into the stage-2 input
    # index_map (or an analytic border correction) to avoid this HBM round-trip
    # of the Cout-channel activation.
    y1_map = y1.reshape(N, Cout, H, W)
    y1_pad = jnp.pad(y1_map, ((0, 0), (0, 0), (1, 1), (1, 1)))
    y1_pad = y1_pad[:, :, ::stride, ::stride]
    Hp, Wp = y1_pad.shape[2], y1_pad.shape[3]
    hw2 = Hp * Wp
    y1p = y1_pad.reshape(N, Cout, hw2)

    tm2 = _pick_tile(hw2)
    grid2 = (N, pl.cdiv(hw2, tm2))
    inv_m2 = 1.0 / float(N * hw2)

    # ---- bn2 statistics ------------------------------------------------------
    st2 = pl.pallas_call(
        functools.partial(stats2_kernel, tm=tm2, hw=hw2),
        out_shape=jax.ShapeDtypeStruct((Cout, 2), f32),
        grid=grid2,
        in_specs=[_act_spec(Cout, tm2), _const_spec((Cout, Cout))],
        out_specs=_const_spec((Cout, 2)),
        compiler_params=_cparams(parallel=False),
    )(y1p, p["w2"])

    # ---- bn3 statistics ------------------------------------------------------
    st3 = pl.pallas_call(
        functools.partial(stats3_kernel, tm=tm2, hw=hw2, inv_m=inv_m2),
        out_shape=jax.ShapeDtypeStruct((Cexp, 2), f32),
        grid=grid2,
        in_specs=[_act_spec(Cout, tm2), _const_spec((Cout, Cout)),
                  _const_spec((Cout, 2)), _const_spec((Cout, 1)), _const_spec((Cout, 1)),
                  _const_spec((Cexp, Cout))],
        out_specs=_const_spec((Cexp, 2)),
        compiler_params=_cparams(parallel=False),
    )(y1p, p["w2"], st2, p["g2"], p["b2"], p["w3"])

    # ---- bnd (downsample) statistics ----------------------------------------
    std = pl.pallas_call(
        functools.partial(statsd_kernel, tm=tm2, hw=hw2, inv_m=inv_m2),
        out_shape=jax.ShapeDtypeStruct((Cexp, 2), f32),
        grid=grid2,
        in_specs=[_act_spec(Cout, tm2), _const_spec((Cout, Cout)),
                  _const_spec((Cout, 2)), _const_spec((Cout, 1)), _const_spec((Cout, 1)),
                  _const_spec((Cexp, Cout)), _const_spec((Cexp, 2)),
                  _const_spec((Cexp, 1)), _const_spec((Cexp, 1)),
                  _const_spec((Cexp, Cexp))],
        out_specs=_const_spec((Cexp, 2)),
        compiler_params=_cparams(parallel=False),
    )(y1p, p["w2"], st2, p["g2"], p["b2"], p["w3"], st3, p["g3"], p["b3"], p["wd"])

    # ---- Final fused pass: bn2/relu/conv3/bn3 + residual + relu --------------
    out = pl.pallas_call(
        functools.partial(final_kernel, inv_m=inv_m2),
        out_shape=jax.ShapeDtypeStruct((N, Cexp, hw2), f32),
        grid=grid2,
        in_specs=[_act_spec(Cout, tm2), _const_spec((Cout, Cout)),
                  _const_spec((Cout, 2)), _const_spec((Cout, 1)), _const_spec((Cout, 1)),
                  _const_spec((Cexp, Cout)), _const_spec((Cexp, 2)),
                  _const_spec((Cexp, 1)), _const_spec((Cexp, 1)),
                  _const_spec((Cexp, Cexp)), _const_spec((Cexp, 2)),
                  _const_spec((Cexp, 1)), _const_spec((Cexp, 1))],
        out_specs=_act_spec(Cexp, tm2),
        compiler_params=_cparams(parallel=True),
    )(y1p, p["w2"], st2, p["g2"], p["b2"], p["w3"], st3, p["g3"], p["b3"],
      p["wd"], std, p["gd"], p["bd"])

    return out.reshape(N, Cexp, Hp, Wp)   # already NCHW


# ----------------------------------------------------------------------------
# Pure-JAX reference (two-pass BN, identical module semantics)
# ----------------------------------------------------------------------------
def ref_forward(x, p, stride=1):
    N, Cin, H, W = x.shape
    Cout = p["w1"].shape[0]
    Cexp = p["w3"].shape[0]

    def bn(h, g, b):
        mean = jnp.mean(h, axis=0, keepdims=True)
        var = jnp.mean((h - mean) ** 2, axis=0, keepdims=True)
        return (h - mean) * jax.lax.rsqrt(var + EPS) * g.T + b.T

    xf = jnp.transpose(x, (0, 2, 3, 1)).reshape(-1, Cin)
    y1 = jnp.maximum(bn(xf @ p["w1"].T, p["g1"], p["b1"]), 0.0)
    y1 = y1.reshape(N, H, W, Cout)
    y1 = jnp.pad(y1, ((0, 0), (1, 1), (1, 1), (0, 0)))[:, ::stride, ::stride, :]
    _, Hp, Wp, _ = y1.shape
    y1 = y1.reshape(-1, Cout)
    a2 = jnp.maximum(bn(y1 @ p["w2"].T, p["g2"], p["b2"]), 0.0)
    x3 = bn(a2 @ p["w3"].T, p["g3"], p["b3"])
    res = bn(x3 @ p["wd"].T, p["gd"], p["bd"])    # downsample applied post-bn3
    out = jnp.maximum(x3 + res, 0.0)
    return jnp.transpose(out.reshape(N, Hp, Wp, Cexp), (0, 3, 1, 2))


if __name__ == "__main__":
    N, Cin, H, W = 2, 16, 16, 16
    Cout, expansion = 4, 4
    Cexp = Cout * expansion       # == Cin (standard bottleneck configuration)
    stride = 1

    key = jax.random.PRNGKey(0)
    kx, k1, k2, k3, kd = jax.random.split(key, 5)
    x = jax.random.normal(kx, (N, Cin, H, W), dtype=jnp.float32)

    params = {
        # 1x1 conv weights in PyTorch layout (Cout, Cin) (= (Cout, Cin, 1, 1) squeezed)
        "w1": 0.2 * jax.random.normal(k1, (Cout, Cin), jnp.float32),
        "w2": 0.2 * jax.random.normal(k2, (Cout, Cout), jnp.float32),
        "w3": 0.2 * jax.random.normal(k3, (Cexp, Cout), jnp.float32),
        "wd": 0.2 * jax.random.normal(kd, (Cexp, Cexp), jnp.float32),
        # BatchNorm2d default init: gamma=1, beta=0 (training-mode batch stats)
        "g1": jnp.ones((Cout, 1), jnp.float32), "b1": jnp.zeros((Cout, 1), jnp.float32),
        "g2": jnp.ones((Cout, 1), jnp.float32), "b2": jnp.zeros((Cout, 1), jnp.float32),
        "g3": jnp.ones((Cexp, 1), jnp.float32), "b3": jnp.zeros((Cexp, 1), jnp.float32),
        "gd": jnp.ones((Cexp, 1), jnp.float32), "bd": jnp.zeros((Cexp, 1), jnp.float32),
    }

    out = jax.block_until_ready(bottleneck_forward(x, params, stride=stride))
    ref = jax.block_until_ready(ref_forward(x, params, stride=stride))

    assert out.shape == (N, Cexp, H + 2, W + 2), out.shape
    assert jnp.allclose(out, ref, rtol=1e-3, atol=1e-3), \
        float(jnp.max(jnp.abs(out - ref)))

    print("KERNEL_OK")
</pallas_src>

<mosaic_0001>
module attributes {stable_mosaic.version = 11 : i64} {
  func.func @stats1_kernel(%arg0: i32, %arg1: i32, %arg2: memref<1x16x256xf32, #tpu.memory_space<vmem>>, %arg3: memref<4x16xf32, #tpu.memory_space<vmem>>, %arg4: memref<1x4x256xf32, #tpu.memory_space<vmem>>, %arg5: memref<4x2xf32, #tpu.memory_space<vmem>>) attributes {dimension_semantics = [#tpu.dimension_semantics<arbitrary>, #tpu.dimension_semantics<arbitrary>], iteration_bounds = array<i64: 2, 1>, scalar_prefetch = 0 : i64, scratch_operands = 0 : i64, tpu.core_type = #tpu.core_type<tc>, window_params = [{transform_indices = @transform_0, window_bounds = array<i64: 1, 16, 256>}, {pipeline_mode = #tpu.pipeline_mode<synchronous>, transform_indices = @transform_1, window_bounds = array<i64: 4, 16>}, {transform_indices = @transform_2, window_bounds = array<i64: 1, 4, 256>}, {pipeline_mode = #tpu.pipeline_mode<synchronous>, transform_indices = @transform_3, window_bounds = array<i64: 4, 2>}]} {
    %c0_i32 = arith.constant 0 : i32
    %0 = arith.cmpi eq, %arg0, %c0_i32 : i32
    %c0_i32_0 = arith.constant 0 : i32
    %1 = arith.cmpi eq, %arg1, %c0_i32_0 : i32
    %2 = arith.andi %0, %1 : i1
    %3 = arith.extui %2 : i1 to i32
    %c0_i32_1 = arith.constant 0 : i32
    %4 = arith.cmpi ne, %3, %c0_i32_1 : i32
    scf.if %4 {
      %cst_18 = arith.constant 0.000000e+00 : f32
      %23 = vector.broadcast %cst_18 : f32 to vector<4x2xf32>
      %c0_19 = arith.constant 0 : index
      %c0_20 = arith.constant 0 : index
      %24 = vector.load %arg5[%c0_19, %c0_20] : memref<4x2xf32, #tpu.memory_space<vmem>>, vector<4x2xf32>
      tpu.vector_store %arg5[%c0_19, %c0_20], %23 {strides = array<i32>} : memref<4x2xf32, #tpu.memory_space<vmem>>, vector<4x2xf32>,
    } else {
    }
    %c0 = arith.constant 0 : index
    %c0_2 = arith.constant 0 : index
    %5 = vector.load %arg3[%c0, %c0_2] : memref<4x16xf32, #tpu.memory_space<vmem>>, vector<4x16xf32>
    %c0_3 = arith.constant 0 : index
    %c0_4 = arith.constant 0 : index
    %c0_5 = arith.constant 0 : index
    %6 = vector.load %arg2[%c0_3, %c0_4, %c0_5] : memref<1x16x256xf32, #tpu.memory_space<vmem>>, vector<1x16x256xf32>
    %7 = vector.shape_cast %6 : vector<1x16x256xf32> to vector<16x256xf32>
    %cst = arith.constant dense<0.000000e+00> : vector<4x256xf32>
    %8 = tpu.matmul %5, %7, %cst {dimension_numbers = #tpu.dot_dimension_numbers<[1], [0], [0], [1], [0, 0, 1, 1], [], []>} : vector<4x16xf32>, vector<16x256xf32>, vector<4x256xf32> -> vector<4x256xf32>
    %c0_6 = arith.constant 0 : index
    %c0_7 = arith.constant 0 : index
    %c0_8 = arith.constant 0 : index
    %9 = vector.load %arg4[%c0_6, %c0_7, %c0_8] : memref<1x4x256xf32, #tpu.memory_space<vmem>>, vector<1x4x256xf32>
    %10 = vector.shape_cast %9 : vector<1x4x256xf32> to vector<4x256xf32>
    %11 = vector.shape_cast %8 : vector<4x256xf32> to vector<1x4x256xf32>
    tpu.vector_store %arg4[%c0_6, %c0_7, %c0_8], %11 {strides = array<i32>} : memref<1x4x256xf32, #tpu.memory_space<vmem>>, vector<1x4x256xf32>,
    %c0_9 = arith.constant 0 : index
    %c0_10 = arith.constant 0 : index
    %12 = vector.load %arg5[%c0_9, %c0_10] : memref<4x2xf32, #tpu.memory_space<vmem>>, vector<4x1xf32>
    %cst_11 = arith.constant dense<0.000000e+00> : vector<4xf32>
    %13 = vector.multi_reduction <add>, %8, %cst_11 [1] : vector<4x256xf32> to vector<4xf32>
    %14 = vector.shape_cast %13 : vector<4xf32> to vector<4x1xf32>
    %15 = arith.addf %12, %14 : vector<4x1xf32>
    %c0_12 = arith.constant 0 : index
    %c0_13 = arith.constant 0 : index
    %16 = vector.load %arg5[%c0_12, %c0_13] : memref<4x2xf32, #tpu.memory_space<vmem>>, vector<4x1xf32>
    tpu.vector_store %arg5[%c0_12, %c0_13], %15 {strides = array<i32>} : memref<4x2xf32, #tpu.memory_space<vmem>>, vector<4x1xf32>,
    %c0_14 = arith.constant 0 : index
    %c1 = arith.constant 1 : index
    %17 = vector.load %arg5[%c0_14, %c1] : memref<4x2xf32, #tpu.memory_space<vmem>>, vector<4x1xf32>
    %18 = arith.mulf %8, %8 : vector<4x256xf32>
    %cst_15 = arith.constant dense<0.000000e+00> : vector<4xf32>
    %19 = vector.multi_reduction <add>, %18, %cst_15 [1] : vector<4x256xf32> to vector<4xf32>
    %20 = vector.shape_cast %19 : vector<4xf32> to vector<4x1xf32>
    %21 = arith.addf %17, %20 : vector<4x1xf32>
    %c0_16 = arith.constant 0 : index
    %c1_17 = arith.constant 1 : index
    %22 = vector.load %arg5[%c0_16, %c1_17] : memref<4x2xf32, #tpu.memory_space<vmem>>, vector<4x1xf32>
    tpu.vector_store %arg5[%c0_16, %c1_17], %21 {strides = array<i32>} : memref<4x2xf32, #tpu.memory_space<vmem>>, vector<4x1xf32>,
    return
  }
  func.func @transform_0(%arg0: i32, %arg1: i32) -> (i32, i32, i32) {
    %c0_i32 = arith.constant 0 : i32
    %c0_i32_0 = arith.constant 0 : i32
    return %arg0, %c0_i32, %arg1 : i32, i32, i32
  }
  func.func @transform_1(%arg0: i32, %arg1: i32) -> (i32, i32) {
    %c0_i32 = arith.constant 0 : i32
    %c0_i32_0 = arith.constant 0 : i32
    %c0_i32_1 = arith.constant 0 : i32
    return %c0_i32, %c0_i32_0 : i32, i32
  }
  func.func @transform_2(%arg0: i32, %arg1: i32) -> (i32, i32, i32) {
    %c0_i32 = arith.constant 0 : i32
    %c0_i32_0 = arith.constant 0 : i32
    return %arg0, %c0_i32, %arg1 : i32, i32, i32
  }
  func.func @transform_3(%arg0: i32, %arg1: i32) -> (i32, i32) {
    %c0_i32 = arith.constant 0 : i32
    %c0_i32_0 = arith.constant 0 : i32
    %c0_i32_1 = arith.constant 0 : i32
    return %c0_i32, %c0_i32_0 : i32, i32
  }
}

</mosaic_0001>

<bundles_post_ra>
// kernel: tpu_custom_call.1
= control target key start
LH: loop header
LB: loop body
LE: loop exit
PB: predicated region body
PF: predicated region fallthrough
CT: control target
= control target key end

     0   :  { %s875_s0 = inlined_call_operand.hbm [shape: f32[2,16,256], index: 0, kind: input, shape index: {}]   ;;  %s876_s1 = inlined_call_operand.hbm [shape: f32[4,16], index: 1, kind: input, shape index: {}]   ;;  %s877_s2 = inlined_call_operand.hbm [shape: f32[2,4,256], index: 2, kind: output, shape index: {0}]   ;;  %s878_s3 = inlined_call_operand.vmem [shape: f32[4,2], index: 3, kind: output, shape index: {1}]  }
   0x1   :  { %879 = sst [smem:[#allocation11_spill]] %s876_s1 }
   0x2   :  { %9 = vsyncpa [#allocation3], 0 }
   0x3   :  { %11 = vsyncpa [#allocation3 + $0x1], 0 }
   0x4   :  { %12 = vsyncpa [#allocation6], 0 }
   0x5   :  { %13 = vsyncpa [#allocation4], 0 }
   0x6   :  { %15 = vsyncpa [#allocation4 + $0x1], 0  ;;  %s698_s12 = smov 0   ;;  %s700_s13 = smov 0  }
   0x7   :  { %s702_s14 = smov 0   ;;  %s704_s15 = smov 0  }
   0x8   :  { %s706_s16 = smov 0   ;;  %s708_s17 = smov 0  }
   0x9 LB: > { %s427_s18 = sadd.s32 4294967295, %s672_s17   ;;  %s428_s19 = sadd.s32 4294967294, %s672_s17   ;;  %s672_s17 = sphi %s708_s17, %s21_s17   ;;  %s668_s16 = sphi %s706_s16, %s892_s16   ;;  %s664_s15 = sphi %s704_s15, %s891_s15   ;;  %s660_s14 = sphi %s702_s14, %s890_s14   ;;  %s656_s13 = sphi %s700_s13, %s889_s13   ;;  %s652_s12 = sphi %s698_s12, %s888_s12  }
   0xa   : > { %s42_s20 = sadd.s32 1, %s660_s14  ;;  %p49_p0 = scmp.ne.s32.totalorder %s660_s14, %s656_s13 }
   0xb   : > { %p50_p1 = scmp.eq.s32.totalorder %s672_s17, 0  ;;  %p55_p2 = scmp.ne.s32.totalorder %s656_s13, %s652_s12 }
   0xc   : > { %p736_p3 = scmp.eq.s32.totalorder %s427_s18, 0  ;;  %p102_p4 = scmp.eq.s32.totalorder %s427_s18, 1 }
   0xd   : > { %p740_p5 = por %p50_p1, %p49_p0  ;;  %p108_p6 = scmp.eq.s32.totalorder %s428_s19, 1 }
   0xe   : > { %p746_p7 = por %p736_p3, %p55_p2  ;;  %p750_p8 = por %p102_p4, %p49_p0 }
   0xf   : > { %p754_p9 = por %p108_p6, %p55_p2  ;;  %p429_p10 = scmp.ge.s32.totalorder %s672_s17, 1 }
  0x10   : > { %p136_p11 = scmp.lt.s32.totalorder %s672_s17, 3  ;;  %s885_s1 = sld [smem:[#allocation11_spill]] }
  0x11   : > { %s674_s30 = smov [#allocation5]   ;;  %p431_p13 = scmp.ge.s32.totalorder %s672_s17, 2 }
  0x12   : > { %p763_p12 = pnand %p429_p10, %p136_p11  ;;  %s150_s4 = sshll.u32 %s674_s30, 4  ;;  %s151_s4 = int_to_ptr.vmem [resolvable:$true] %s150_s4 }
  0x13   : > { %p471_p1 = scmp.lt.s32.totalorder %s672_s17, 2  ;;  %s33_s6 = sadd.s32 1, %s668_s16 }
  0x14   : > { %p458_p0 = pneg %p763_p12  ;;  %p35_p6 = scmp.ge.s32.totalorder %s33_s6, 2 }
  0x15   : > { %p775_p4 = pnand %p471_p1, %p740_p5  ;;  %s161_s7 = sand.u32 1, %s660_s14  }
  0x16   : > { %s148_s28 = sshll.u32 %s885_s1, 4  ;;  %p459_p2 = pnand %p458_p0, %p736_p3  ;;  %s149_s28 = int_to_ptr.hbm [resolvable:$true] %s148_s28 }
  0x17   : > { %s894_s6 = smov (%p35_p6, %s33_s6), 0  ;;  %s432_s8 = sshll.u32 %s161_s7, 5 }
  0x18   : > { %461 = dma.hbm_to_vmem [thread:$0]  (!%p459_p2), %s149_s28, 64, %s151_s4, [#allocation6]  }
  0x19   : > { %s37_s9 = ssub.s32 %s668_s16, %s894_s6  ;;  %s447_s10 = sshll.u32 %s668_s16, 5 }
  0x1a   : > { %p40_p10 = scmp.eq.s32.totalorder %s37_s9, 0  ;;  %s172_s19 = scalar_lea.hbm %s875_s0, %s447_s10 }
  0x1b   : > { %s165_s22 = scalar_lea.vmem [#allocation2], %s432_s8  ;;  %s173_s30 = sshll.u32 %s172_s19, 4  ;;  %s174_s30 = int_to_ptr.hbm [resolvable:$true] %s173_s30 }
  0x1c   : > { %s175_s26 = sshll.u32 %s165_s22, 4  ;;  %s162_s28 = scalar_lea.sflag [#allocation3], %s161_s7  ;;  %s176_s26 = int_to_ptr.vmem [resolvable:$true] %s175_s26 }
  0x1d   : > { %s792_s27 = scalar_select %p40_p10, %s660_s14, %s42_s20  }
  0x1e   : > { %s675_s4 = smov 256   ;;  %s676_s1 = smov 16  }
  0x1f   : > { %465 = dma.hbm_to_vmem [thread:$0]  (!%p775_p4), %s174_s30, 512, %s176_s26, %s162_s28, %s675_s4, %s675_s4, %s676_s1  }
  0x20   : > { %187 = sbr.rel (%p763_p12) target bundleno = 309 (0x135), region = 28  ;;  %s799_s9 = sand.u32 (!%p763_p12), 1, %s656_s13  }
  0x21   : > { %s436_s8 = sshll.u32 (!%p763_p12), %s799_s9, 5  ;;  %s190_s20 = scalar_lea.sflag (!%p763_p12), [#allocation3], %s799_s9 }
  0x22   : > { %s193_s10 = scalar_lea.vmem (!%p763_p12), [#allocation2], %s436_s8 }
  0x25   : > { %639 = dma.done.wait (%p746_p7), %s190_s20, 512  }
  0x26   : > { %641 = vsyncadd (%p746_p7), %s190_s20, 4294966784 }
  0x27   : > { %643 = dma.done.wait (%p736_p3), [#allocation6], 64  }
  0x28   : > { %645 = vsyncadd (%p736_p3), [#allocation6], 4294967232  ;;  %s438_s1 = sshll.u32 %s799_s9, 3  ;;  %p224_p5 = scmp.eq.s32.totalorder %s664_s15, 0 }
  0x29   : > { %s813_s29 = scalar_lea.vmem [#allocation7], %s438_s1  ;;  %vm230_vm0 = vcmask (%p224_p5), 11264   ;;  %v677_v0 = vmov (%p224_p5), 0.0  }
  0x2a   : > { %229 = sbr.rel (!%p224_p5) target bundleno = 47 (0x2f), region = 40  ;;  %231 = vst.msk [vmem:[%s878_s3] sm:$0xf] (%p224_p5), %vm230_vm0, %v677_v0 }
  0x2f PF: > { %v235_v1 = vld [vmem:[%s193_s10 + $0x10] sm:$0xff]  ;;  %v236_v2 = vld [vmem:[%s193_s10 + $0x18] sm:$0xff]  ;;  %v233_v3 = vld [vmem:[%s193_s10] sm:$0xff]  ;;  %vm237_vm1 = vcmask 130048   ;;  %vm284_vm2 = vcmask 1043456   ;;  %s449_s21 = sshll.u32 %s664_s15, 3 }
  0x30   : > { %255 = vmatpush.msra.mxu0 %v235_v1  ;;  %275 = vmatpush.msra.mxu1 %v236_v2  ;;  %v234_v4 = vld [vmem:[%s193_s10 + $0x8] sm:$0xff]  ;;  %v232_v5 = vld [vmem:[#allocation5] sm:$0xf]  ;;  %s322_s18 = scalar_lea.hbm %s877_s2, %s449_s21  ;;  %s324_s19 = sshll.u32 %s813_s29, 4  ;;  %s325_s19 = int_to_ptr.vmem [resolvable:$true] %s324_s19 }
  0x31   : > { %s326_s22 = sshll.u32 %s322_s18, 4  ;;  %s309_s26 = scalar_lea.sflag [#allocation4], %s799_s9  ;;  %s327_s22 = int_to_ptr.hbm [resolvable:$true] %s326_s22 }
  0x32   : > { %256 = vmatpush.msra.mxu0 %v233_v3  ;;  %276 = vmatpush.msra.mxu1 %v234_v4  ;;  %s600_s15 = sshra.s32 %s327_s22, 4  ;;  %s606_s8 = scalar_lea.hbm %s877_s2, 16  ;;  %s601_s15 = int_to_ptr.hbm [resolvable:$true] %s600_s15 }
  0x33   : > { %440 = vmatmul.msk.f32.vlgmr.msra.gmra.mxu0 %vm237_vm1, %v232_v5  ;;  %441 = vmatmul.msk.f32.vlgmr.msra.gmra.mxu1 %vm237_vm1, %v232_v5  ;;  %s602_s30 = scalar_lea.hbm %s601_s15, 8  ;;  %p607_p12 = scmp.lt.s32.totalorder %s601_s15, %s877_s2 }
  0x34   : > { %p603_p3 = scmp.ne.s32.totalorder %s601_s15, %s602_s30  ;;  %p608_p0 = scmp.lt.s32.totalorder %s606_s8, %s602_s30 }
  0x36   : > { %p604_p7 = pnand %p603_p3, %p750_p8  ;;  %p609_p1 = por %p608_p0, %p607_p12 }
  0x38   : > { %p605_p11 = pneg %p604_p7 }
  0x3a   : > { %p610_p2 = pnand %p609_p1, %p605_p11 }
  0xb0   : > { %v258_v6 = vpop.f32.mrf.mxu0  ;;  %v278_v7 = vpop.f32.mrf.mxu1 }
  0xb1   : > { %v283_v8 = vrot.slane %v278_v7, 4  ;;  %v289_v9 = vsel %vm284_vm2, %v258_v6, 0.0  ;;  %v290_v10 = vsel %vm284_vm2, %v278_v7, 0.0  ;;  %v298_v13 = vmul.f32 %v258_v6, %v258_v6 }
  0xb2   : > { %v291_v11 = vadd.f32 %v290_v10, %v289_v9  ;;  %v299_v14 = vmul.f32 %v278_v7, %v278_v7 }
  0xb3   : > { %v285_v12 = vsel %vm284_vm2, %v258_v6, %v283_v8 }
  0xb4   : > { %287 = vst [vmem:[%s813_s29] sm:$0xff] %v285_v12  ;;  %292 = vadd.xlane.f32.xlu0 %v291_v11 }
  0xb5   : > { %613 = shalt.err (!%p610_p2)
}
  0xb6   : > { %456 = dma.vmem_to_hbm [thread:$0]  (%p750_p8), %s325_s19, 128, %s327_s22, %s309_s26   ;;  %v300_v15 = vsel %vm284_vm2, %v298_v13, 0.0  ;;  %v301_v16 = vsel %vm284_vm2, %v299_v14, 0.0  ;;  %v288_v18 = vld [vmem:[%s878_s3] sm:$0xf]  ;;  %vm295_vm3 = vcmask 3072  }
  0xb7   : > { %v302_v17 = vadd.f32 %v301_v16, %v300_v15  ;;  %vm306_vm4 = vcmask 11272  }
  0xbc   : > { %303 = vadd.xlane.f32.xlu0 %v302_v17 }
 0x127   : > { %v293_v19 = vpop.xlane.xlu0 %292 }
 0x128   : > { %v294_v20 = vadd.f32 %v293_v19, %v288_v18 }
 0x12a   : > { %296 = vst.msk [vmem:[%s878_s3] sm:$0xf] %vm295_vm3, %v294_v20 }
 0x12f   : > { %v304_v22 = vpop.xlane.xlu0 %303 }
 0x131   : > { %v297_v21 = vld [vmem:[%s878_s3] sm:$0xf] }
 0x132   : > { %v305_v23 = vadd.f32 %v304_v22, %v297_v21 }
 0x134   : > { %307 = vst.msk [vmem:[%s878_s3] sm:$0xf] %vm306_vm4, %v305_v23 }
 0x135 PF: > { %s344_s11 = sand.u32 1, %s652_s12   ;;  %p467_p8 = pnand %p431_p13, %p754_p9 }
 0x136   : > { %s345_s18 = scalar_lea.sflag [#allocation4], %s344_s11 }
 0x137   : > { %p468_p4 = pneg %p467_p8 }
 0x139   : > { %647 = dma.done.wait (%p468_p4), %s345_s18, 128  }
 0x13a   : > { %649 = vsyncadd (%p468_p4), %s345_s18, 4294967168  ;;  %s21_s17 = sadd.s32 1, %s672_s17   ;;  %s888_s12 = smov %s656_s13 }
 0x13b   : > { %p18_p6 = scmp.ge.s32.totalorder %s21_s17, 4   ;;  %s889_s13 = smov %s660_s14 }
 0x13c   : > { %s890_s14 = smov %s792_s27  ;;  %s891_s15 = smov %s668_s16 }
 0x13d   : > { %s892_s16 = smov %s894_s6  ;;  %20 = sbr.rel (!%p18_p6) target bundleno = 9 (0x9), region = 89 }
 0x142   :  { %351 = vsyncpa [#allocation3], 1 }
 0x143   :  { %353 = vsyncpa [#allocation3 + $0x1], 1 }
 0x144   :  { %354 = vsyncpa [#allocation6], 1 }
 0x145   :  { %355 = vsyncpa [#allocation4], 1 }
 0x146   :  { %357 = vsyncpa [#allocation4 + $0x1], 1 }

</bundles_post_ra>
